<compile_context>
chip_gen: v7x
topology: tpu7x:2x2x1
jax: 0.10.0
libtpu: 0.0.40
codegen_flags: <defaults>
</compile_context>

<pallas_src>
import functools

import jax
import jax.numpy as jnp
from jax import lax
from jax.experimental import pallas as pl
from jax.experimental.pallas import tpu as pltpu


def _sparse_mha_kernel(a_ref, q_ref, k_ref, v_ref, o_ref, *, n_valid,
                       mask_padded):
    """One (row_tile, head) grid step: masked scores -> softmax -> p @ v."""
    q = q_ref[...]                      # (tile_rows, head_dim) bf16, pre-scaled
    k = k_ref[...]                      # (n_pad, head_dim)     bf16

    # Scores: contract the last dims directly (no explicit k.T transpose).
    s = lax.dot_general(q, k,
                        dimension_numbers=(((1,), (1,)), ((), ())),
                        preferred_element_type=jnp.float32)   # (tile_rows, n_pad)
    s = s * a_ref[...].astype(jnp.float32)

    if mask_padded:
        # Padded key columns must not contribute exp(0 - rowmax) to the
        # softmax denominator.  (Compiled in only when n_pad != N.)
        col = lax.broadcasted_iota(jnp.int32, s.shape, 1)
        s = jnp.where(col < n_valid, s, -1e30)

    # Softmax with deferred normalization (divide moved after p @ v).
    s = s - jnp.max(s, axis=-1, keepdims=True)
    p = jnp.exp(s)
    denom = jnp.sum(p, axis=-1, keepdims=True)              # (tile_rows, 1)

    o = jnp.dot(p.astype(jnp.bfloat16), v_ref[...],
                preferred_element_type=jnp.float32)          # (tile_rows, d)
    o = o * pl.reciprocal(denom, approx=True)
    o_ref[...] = o.astype(o_ref.dtype)


def _generation_defaults():
    """(row_tile, vmem_limit_bytes) chosen per TPU generation."""
    try:
        kind = jax.devices()[0].device_kind.lower()
    except Exception:  # pragma: no cover - defensive
        kind = ""
    is_v7 = "7" in kind
    if is_v7:
        return 256, 48 * 1024 * 1024    # 64 MiB physical VMEM on v7x
    return 512, 96 * 1024 * 1024        # 128 MiB physical VMEM on v5e/v6e


def sparse_mha(A, h, Wq, Wk, Wv, Wo, num_heads, *, row_tile=None,
               vmem_limit_bytes=None):
    N, hidden = h.shape
    head_dim = hidden // num_heads
    scaling = float(hidden) ** (-0.5)

    gen_tile, gen_vmem = _generation_defaults()
    if row_tile is None:
        row_tile = gen_tile
    if vmem_limit_bytes is None:
        vmem_limit_bytes = gen_vmem

    # Row tiling: multiple of 8 sublanes; pad N (never collapse to one tile).
    tile_rows = min(row_tile, N)
    tile_rows = -(-tile_rows // 8) * 8
    n_pad = -(-N // tile_rows) * tile_rows
    num_row_tiles = n_pad // tile_rows
    mask_padded = n_pad != N

    f32 = jnp.float32
    bf16 = jnp.bfloat16

    # A in bf16 ({0,1} adjacency is exact in bf16); pad with zeros.
    A_pad = jnp.pad(A.astype(bf16), ((0, n_pad - N), (0, n_pad - N)))
    h_pad = jnp.pad(h.astype(f32), ((0, n_pad - N), (0, 0)))

    # Per-head weight slabs matching PyTorch reshape(N, head_dim, H):
    # hidden column c = d*num_heads + hh belongs to head hh.
    Wq_heads = (Wq.astype(f32).reshape(head_dim, num_heads, hidden)
                .transpose(1, 2, 0) * scaling)            # (H, hidden, d), scaled
    Wk_heads = Wk.astype(f32).reshape(head_dim, num_heads, hidden).transpose(1, 2, 0)
    Wv_heads = Wv.astype(f32).reshape(head_dim, num_heads, hidden).transpose(1, 2, 0)
    Wo_heads = Wo.astype(f32).reshape(hidden, head_dim, num_heads).transpose(2, 1, 0)
    #   Wo_heads[hh, d, i] = Wo[i, d*H + hh]

    # Dense projections once, at full MXU width/depth, in XLA; cast to bf16
    # for the attention core.
    q_heads = jnp.einsum('nc,hcd->hnd', h_pad, Wq_heads).astype(bf16)
    k_heads = jnp.einsum('nc,hcd->hnd', h_pad, Wk_heads).astype(bf16)
    v_heads = jnp.einsum('nc,hcd->hnd', h_pad, Wv_heads).astype(bf16)

    kernel = functools.partial(_sparse_mha_kernel, n_valid=N,
                               mask_padded=mask_padded)

    o_heads = pl.pallas_call(
        kernel,
        out_shape=jax.ShapeDtypeStruct((num_heads, n_pad, head_dim), bf16),
        grid_spec=pltpu.PrefetchScalarGridSpec(
            num_scalar_prefetch=0,
            grid=(num_row_tiles, num_heads),
            in_specs=[
                # A row tile (full key axis); block index constant across the
                # inner head axis, so it is DMA'd once per row tile.
                pl.BlockSpec((tile_rows, n_pad), lambda r, hh: (r, 0)),
                # per-head Q rows (pre-scaled)
                pl.BlockSpec((pl.Squeezed(), tile_rows, head_dim),
                             lambda r, hh: (hh, r, 0)),
                # per-head full K / V (precomputed outside the kernel)
                pl.BlockSpec((pl.Squeezed(), n_pad, head_dim),
                             lambda r, hh: (hh, 0, 0)),
                pl.BlockSpec((pl.Squeezed(), n_pad, head_dim),
                             lambda r, hh: (hh, 0, 0)),
            ],
            out_specs=pl.BlockSpec((pl.Squeezed(), tile_rows, head_dim),
                                   lambda r, hh: (hh, r, 0)),
        ),
        compiler_params=pltpu.CompilerParams(
            # Every (row tile, head) step is fully independent (no accumulator).
            dimension_semantics=("parallel", "parallel"),
            vmem_limit_bytes=vmem_limit_bytes),
    )(A_pad, q_heads, k_heads, v_heads)

    # Deferred out-projection: one full-depth matmul over head-major output.
    out = jnp.einsum('hnd,hdi->ni', o_heads, Wo_heads.astype(bf16),
                     preferred_element_type=jnp.float32)
    return out[:N]


def sparse_mha_reference(A, h, Wq, Wk, Wv, Wo, num_heads):
    """Pure-JAX (f32) transcription of the PyTorch forward, for validation."""
    N, hidden = h.shape
    head_dim = hidden // num_heads
    scaling = float(hidden) ** (-0.5)
    q = (h @ Wq.T).reshape(N, head_dim, num_heads) * scaling
    k = (h @ Wk.T).reshape(N, head_dim, num_heads)
    v = (h @ Wv.T).reshape(N, head_dim, num_heads)
    qh = jnp.transpose(q, (2, 0, 1))          # (H, N, head_dim)
    kh = jnp.transpose(k, (2, 1, 0))          # (H, head_dim, N)
    vh = jnp.transpose(v, (2, 0, 1))          # (H, N, head_dim)
    attn = A * jnp.einsum('hnd,hdm->hnm', qh, kh)
    attn = jax.nn.softmax(attn, axis=2)
    out = jnp.einsum('hnm,hmd->hnd', attn, vh)           # (H, N, head_dim)
    out = jnp.transpose(out, (1, 2, 0)).reshape(N, -1)   # (N, head_dim*H)
    return out @ Wo.T


if __name__ == "__main__":
    N, hidden, num_heads = 20, 32, 4

    key = jax.random.PRNGKey(0)
    k_a, k_h, k_q, k_k, k_v, k_o = jax.random.split(key, 6)

    # Synthetic adjacency (dense (N,N) mask with self-loops) and node features.
    A = (jax.random.uniform(k_a, (N, N)) > 0.5).astype(jnp.float32)
    A = jnp.maximum(A, jnp.eye(N, dtype=jnp.float32))
    h = jax.random.normal(k_h, (N, hidden), dtype=jnp.float32)

    # Deterministic Linear weights (PyTorch convention: (out_features, in_features)).
    scale = 1.0 / (hidden ** 0.5)
    Wq = jax.random.uniform(k_q, (hidden, hidden), minval=-scale, maxval=scale)
    Wk = jax.random.uniform(k_k, (hidden, hidden), minval=-scale, maxval=scale)
    Wv = jax.random.uniform(k_v, (hidden, hidden), minval=-scale, maxval=scale)
    Wo = jax.random.uniform(k_o, (hidden, hidden), minval=-scale, maxval=scale)

    # Case 1: ragged N (20) with row_tile=8 -> 3 row tiles, padded key columns.
    out = sparse_mha(A, h, Wq, Wk, Wv, Wo, num_heads, row_tile=8)
    out = jax.block_until_ready(out)
    ref = sparse_mha_reference(A, h, Wq, Wk, Wv, Wo, num_heads)
    assert out.shape == (N, hidden)
    assert jnp.allclose(out, ref, rtol=3e-2, atol=3e-2), "mismatch (padded case)"

    # Case 2: exact-fit N (16) -> 2 row tiles, no padding path.
    N2 = 16
    out2 = sparse_mha(A[:N2, :N2], h[:N2], Wq, Wk, Wv, Wo, num_heads, row_tile=8)
    out2 = jax.block_until_ready(out2)
    ref2 = sparse_mha_reference(A[:N2, :N2], h[:N2], Wq, Wk, Wv, Wo, num_heads)
    assert out2.shape == (N2, hidden)
    assert jnp.allclose(out2, ref2, rtol=3e-2, atol=3e-2), "mismatch (exact case)"

    print("KERNEL_OK")
</pallas_src>

<mosaic_0001>
module attributes {stable_mosaic.version = 11 : i64} {
  func.func @_sparse_mha_kernel(%arg0: i32, %arg1: i32, %arg2: memref<8x24xbf16, #tpu.memory_space<vmem>>, %arg3: memref<1x8x8xbf16, #tpu.memory_space<vmem>>, %arg4: memref<1x24x8xbf16, #tpu.memory_space<vmem>>, %arg5: memref<1x24x8xbf16, #tpu.memory_space<vmem>>, %arg6: memref<1x8x8xbf16, #tpu.memory_space<vmem>>) attributes {dimension_semantics = [#tpu.dimension_semantics<parallel>, #tpu.dimension_semantics<parallel>], iteration_bounds = array<i64: 3, 4>, scalar_prefetch = 0 : i64, scratch_operands = 0 : i64, tpu.core_type = #tpu.core_type<tc>, window_params = [{transform_indices = @transform_0, window_bounds = array<i64: 8, 24>}, {transform_indices = @transform_1, window_bounds = array<i64: 1, 8, 8>}, {transform_indices = @transform_2, window_bounds = array<i64: 1, 24, 8>}, {transform_indices = @transform_3, window_bounds = array<i64: 1, 24, 8>}, {transform_indices = @transform_4, window_bounds = array<i64: 1, 8, 8>}]} {
    %c0 = arith.constant 0 : index
    %c0_0 = arith.constant 0 : index
    %c0_1 = arith.constant 0 : index
    %0 = vector.load %arg3[%c0, %c0_0, %c0_1] : memref<1x8x8xbf16, #tpu.memory_space<vmem>>, vector<1x8x8xbf16>
    %1 = vector.shape_cast %0 : vector<1x8x8xbf16> to vector<8x8xbf16>
    %c0_2 = arith.constant 0 : index
    %c0_3 = arith.constant 0 : index
    %c0_4 = arith.constant 0 : index
    %2 = vector.load %arg4[%c0_2, %c0_3, %c0_4] : memref<1x24x8xbf16, #tpu.memory_space<vmem>>, vector<1x24x8xbf16>
    %3 = vector.shape_cast %2 : vector<1x24x8xbf16> to vector<24x8xbf16>
    %cst = arith.constant dense<0.000000e+00> : vector<8x24xf32>
    %4 = tpu.matmul %1, %3, %cst {dimension_numbers = #tpu.dot_dimension_numbers<[1], [1], [0], [0], [0, 0, 1, 0], [], []>} : vector<8x8xbf16>, vector<24x8xbf16>, vector<8x24xf32> -> vector<8x24xf32>
    %c0_5 = arith.constant 0 : index
    %c0_6 = arith.constant 0 : index
    %5 = vector.load %arg2[%c0_5, %c0_6] : memref<8x24xbf16, #tpu.memory_space<vmem>>, vector<8x24xbf16>
    %6 = arith.extf %5 : vector<8x24xbf16> to vector<8x24xf32>
    %7 = arith.mulf %4, %6 : vector<8x24xf32>
    %8 = tpu.iota {dimensions = array<i32: 1>} : vector<8x24xi32>
    %c20_i32 = arith.constant 20 : i32
    %9 = vector.broadcast %c20_i32 : i32 to vector<8x24xi32>
    %10 = arith.cmpi slt, %8, %9 : vector<8x24xi32>
    %cst_7 = arith.constant -1.000000e+30 : f32
    %11 = vector.broadcast %cst_7 : f32 to vector<8x24xf32>
    %12 = arith.select %10, %7, %11 : vector<8x24xi1>, vector<8x24xf32>
    %cst_8 = arith.constant dense<0xFF800000> : vector<8xf32>
    %13 = vector.multi_reduction <maximumf>, %12, %cst_8 [1] : vector<8x24xf32> to vector<8xf32>
    %14 = vector.shape_cast %13 : vector<8xf32> to vector<8x1xf32>
    %15 = vector.broadcast %14 : vector<8x1xf32> to vector<8x24xf32>
    %16 = arith.subf %12, %15 : vector<8x24xf32>
    %17 = math.exp %16 : vector<8x24xf32>
    %cst_9 = arith.constant dense<0.000000e+00> : vector<8xf32>
    %18 = vector.multi_reduction <add>, %17, %cst_9 [1] : vector<8x24xf32> to vector<8xf32>
    %19 = vector.shape_cast %18 : vector<8xf32> to vector<8x1xf32>
    %20 = arith.truncf %17 : vector<8x24xf32> to vector<8x24xbf16>
    %c0_10 = arith.constant 0 : index
    %c0_11 = arith.constant 0 : index
    %c0_12 = arith.constant 0 : index
    %21 = vector.load %arg5[%c0_10, %c0_11, %c0_12] : memref<1x24x8xbf16, #tpu.memory_space<vmem>>, vector<1x24x8xbf16>
    %22 = vector.shape_cast %21 : vector<1x24x8xbf16> to vector<24x8xbf16>
    %cst_13 = arith.constant dense<0.000000e+00> : vector<8x8xf32>
    %23 = tpu.matmul %20, %22, %cst_13 {dimension_numbers = #tpu.dot_dimension_numbers<[1], [0], [0], [1], [0, 0, 1, 1], [], []>} : vector<8x24xbf16>, vector<24x8xbf16>, vector<8x8xf32> -> vector<8x8xf32>
    %24 = tpu.reciprocal %19 {approx = true} : vector<8x1xf32> -> vector<8x1xf32>
    %25 = vector.broadcast %24 : vector<8x1xf32> to vector<8x8xf32>
    %26 = arith.mulf %23, %25 : vector<8x8xf32>
    %27 = arith.truncf %26 : vector<8x8xf32> to vector<8x8xbf16>
    %c0_14 = arith.constant 0 : index
    %c0_15 = arith.constant 0 : index
    %c0_16 = arith.constant 0 : index
    %28 = vector.load %arg6[%c0_14, %c0_15, %c0_16] : memref<1x8x8xbf16, #tpu.memory_space<vmem>>, vector<1x8x8xbf16>
    %29 = vector.shape_cast %28 : vector<1x8x8xbf16> to vector<8x8xbf16>
    %30 = vector.shape_cast %27 : vector<8x8xbf16> to vector<1x8x8xbf16>
    tpu.vector_store %arg6[%c0_14, %c0_15, %c0_16], %30 {strides = array<i32>} : memref<1x8x8xbf16, #tpu.memory_space<vmem>>, vector<1x8x8xbf16>,
    return
  }
  func.func @transform_0(%arg0: i32, %arg1: i32) -> (i32, i32) {
    %c0_i32 = arith.constant 0 : i32
    %c0_i32_0 = arith.constant 0 : i32
    return %arg0, %c0_i32 : i32, i32
  }
  func.func @transform_1(%arg0: i32, %arg1: i32) -> (i32, i32, i32) {
    %c0_i32 = arith.constant 0 : i32
    %c0_i32_0 = arith.constant 0 : i32
    return %arg1, %arg0, %c0_i32 : i32, i32, i32
  }
  func.func @transform_2(%arg0: i32, %arg1: i32) -> (i32, i32, i32) {
    %c0_i32 = arith.constant 0 : i32
    %c0_i32_0 = arith.constant 0 : i32
    %c0_i32_1 = arith.constant 0 : i32
    return %arg1, %c0_i32, %c0_i32_0 : i32, i32, i32
  }
  func.func @transform_3(%arg0: i32, %arg1: i32) -> (i32, i32, i32) {
    %c0_i32 = arith.constant 0 : i32
    %c0_i32_0 = arith.constant 0 : i32
    %c0_i32_1 = arith.constant 0 : i32
    return %arg1, %c0_i32, %c0_i32_0 : i32, i32, i32
  }
  func.func @transform_4(%arg0: i32, %arg1: i32) -> (i32, i32, i32) {
    %c0_i32 = arith.constant 0 : i32
    %c0_i32_0 = arith.constant 0 : i32
    return %arg1, %arg0, %c0_i32 : i32, i32, i32
  }
}

</mosaic_0001>

<bundles_post_ra>
// kernel: tpu_custom_call.1
= control target key start
LH: loop header
LB: loop body
LE: loop exit
PB: predicated region body
PF: predicated region fallthrough
CT: control target
= control target key end

     0   :  { %s1661_s0 = inlined_call_operand.hbm [shape: bf16[24,24], index: 0, kind: input, shape index: {}]   ;;  %s1662_s1 = inlined_call_operand.hbm [shape: bf16[4,24,8], index: 1, kind: input, shape index: {}]   ;;  %s1663_s2 = inlined_call_operand.hbm [shape: bf16[4,24,8], index: 2, kind: input, shape index: {}]   ;;  %s1664_s3 = inlined_call_operand.hbm [shape: bf16[4,24,8], index: 3, kind: input, shape index: {}]   ;;  %s1665_s4 = inlined_call_operand.hbm [shape: bf16[4,24,8], index: 4, kind: output, shape index: {}]  }
   0x1   :  { %1683 = sst [smem:[#allocation28_spill]] %s1662_s1 }
   0x2   :  { %1684 = sst [smem:[#allocation29_spill]] %s1665_s4 }
   0x3   :  { %9 = vsyncpa [#allocation3], 0 }
   0x4   :  { %11 = vsyncpa [#allocation3 + $0x1], 0 }
   0x5   :  { %12 = vsyncpa [#allocation6], 0 }
   0x6   :  { %14 = vsyncpa [#allocation6 + $0x1], 0 }
   0x7   :  { %15 = vsyncpa [#allocation9], 0 }
   0x8   :  { %17 = vsyncpa [#allocation9 + $0x1], 0 }
   0x9   :  { %18 = vsyncpa [#allocation4], 0 }
   0xa   :  { %20 = vsyncpa [#allocation4 + $0x1], 0  ;;  %s1177_s15 = smov 0   ;;  %s1179_s16 = smov 0  }
   0xb   :  { %s1181_s17 = smov 0   ;;  %s1183_s18 = smov 0  }
   0xc   :  { %s1185_s19 = smov 0   ;;  %s1187_s20 = smov 0  }
   0xd   :  { %s1189_s21 = smov 0   ;;  %s1191_s22 = smov 0  }
   0xe   :  { %s1193_s23 = smov 0   ;;  %s1195_s24 = smov 0  }
   0xf   :  { %s1197_s25 = smov 0   ;;  %s1199_s26 = smov 0  }
  0x10   :  { %s1201_s27 = smov 0   ;;  %s1203_s28 = smov 0  }
  0x11 LB: > { %1685 = sst [smem:[#allocation16_spill]] %s1101_s18  ;;  %s1248_s29 = sadd.s32 4294967295, %s1141_s28   ;;  %s1141_s28 = sphi %s1203_s28, %s26_s28   ;;  %s1137_s27 = sphi %s1201_s27, %s1733_s27   ;;  %s1133_s26 = sphi %s1199_s26, %s1743_s26   ;;  %s1129_s25 = sphi %s1197_s25, %s1731_s25   ;;  %s1125_s24 = sphi %s1195_s24, %s1742_s24   ;;  %s1121_s23 = sphi %s1193_s23, %s1741_s23   ;;  %s1117_s22 = sphi %s1191_s22, %s1740_s22   ;;  %s1113_s21 = sphi %s1189_s21, %s1739_s21   ;;  %s1109_s20 = sphi %s1187_s20, %s1729_s20   ;;  %s1105_s19 = sphi %s1185_s19, %s1738_s19   ;;  %s1101_s18 = sphi %s1183_s18, %s1737_s18   ;;  %s1097_s17 = sphi %s1181_s17, %s1736_s17   ;;  %s1093_s16 = sphi %s1179_s16, %s1735_s16   ;;  %s1089_s15 = sphi %s1177_s15, %s1734_s15  }
  0x12   : > { %1686 = sst [smem:[#allocation17_spill]] %s1109_s20  ;;  %s658_s30 = sadd.s32 4294967294, %s1141_s28  }
  0x13   : > { %1687 = sst [smem:[#allocation18_spill]] %s1125_s24  ;;  %s35_s5 = sadd.s32 1, %s1133_s26 }
  0x14   : > { %1688 = sst [smem:[#allocation19_spill]] %s1129_s25  ;;  %s38_s6 = sadd.s32 1, %s1137_s27 }
  0x15   : > { %1689 = sst [smem:[#allocation20_spill]] %s1137_s27  ;;  %p36_p0 = scmp.ge.s32.totalorder %s35_s5, 4 }
  0x16   : > { %p1670_p1 = scmp.eq.s32.totalorder %s1141_s28, 0  ;;  %p1677_p2 = scmp.eq.s32.totalorder %s1248_s29, 0 }
  0x17   : > { %s73_s7 = sadd.s32 1, %s1109_s20  ;;  %s1745_s5 = smov (%p36_p0, %s35_s5), 0 }
  0x18   : > { %1690 = sst [smem:[#allocation21_spill]] %s1745_s5  ;;  %s1747_s6 = smov (!%p36_p0, %s38_s6), %s1137_s27 }
  0x19   : > { %s68_s8 = ssub.s32 %s1133_s26, %s1745_s5  ;;  %p80_p3 = scmp.ne.s32.totalorder %s1109_s20, %s1105_s19 }
  0x1a   : > { %p40_p4 = scmp.ge.s32.totalorder %s1747_s6, 3  ;;  %p1669_p5 = scmp.ne.s32.totalorder %s1105_s19, %s1101_s18 }
  0x1b   : > { %p1270_p6 = por %p80_p3, %p1670_p1  ;;  %p97_p7 = scmp.eq.s32.totalorder %s68_s8, 0 }
  0x1c   : > { %s1749_s6 = smov (%p40_p4, %s1747_s6), 0  ;;  %p1281_p8 = por %p1669_p5, %p1677_p2 }
  0x1d   : > { %1692 = sst [smem:[#allocation22_spill]] %s1749_s6  ;;  %s99_s11 = sadd.s32 1, %s1097_s17 }
  0x1e   : > { %s1693_s10 = scalar_select %p1281_p8, 1, 0 }
  0x1f   : > { %s1288_s12 = ssub.s32 %s1137_s27, %s1749_s6  ;;  %p106_p9 = scmp.ne.s32.totalorder %s1097_s17, %s1093_s16 }
  0x20   : > { %s70_s13 = sor.u32 %s68_s8, %s1288_s12  ;;  %p112_p10 = scmp.ne.s32.totalorder %s1093_s16, %s1089_s15 }
  0x21   : > { %p71_p11 = scmp.eq.s32.totalorder %s70_s13, 0  ;;  %p1297_p12 = por %p106_p9, %p1670_p1 }
  0x22   : > { %s1302_s5 = scalar_select %p97_p7, %s1097_s17, %s99_s11  }
  0x23   : > { %s1305_s4 = scalar_select %p71_p11, %s1109_s20, %s73_s7  }
  0x24   : > { %1695 = sst [smem:[#allocation23_spill]] %s1302_s5  ;;  %p1309_p13 = por %p112_p10, %p1677_p2 }
  0x25   : > { %1696 = sst [smem:[#allocation24_spill]] %s1305_s4  ;;  %p164_p0 = scmp.eq.s32.totalorder %s1248_s29, 11 }
  0x26   : > { %s1697_s6 = scalar_select %p1309_p13, 1, 0 }
  0x27   : > { %p170_p4 = scmp.eq.s32.totalorder %s658_s30, 11  ;;  %p1317_p5 = por %p164_p0, %p80_p3 }
  0x28   : > { %p1678_p9 = scmp.lt.s32.totalorder %s1141_s28, 12  ;;  %p1700_p1 = scmp.ne.s32.totalorder %s1105_s19, %s1101_s18 }
  0x29   : > { %s1698_s15 = scalar_select %p1317_p5, 1, 0 }
  0x2a   : > { %p1325_p8 = por %p170_p4, %p1700_p1  ;;  %s208_s7 = sand.u32 1, %s1141_s28  }
  0x2b   : > { %1699 = sst [smem:[#allocation25_spill]] %s1698_s15  ;;  %s210_s11 = sand.u32 1, %s1109_s20  }
  0x2c   : > { %s1701_s8 = scalar_select %p1325_p8, 1, 0 }
  0x2d   : > { %s663_s13 = sshll.u32 %s210_s11, 2  ;;  %s703_s4 = smul.u32 3, %s1133_s26 }
  0x2e   : > { %1702 = sst [smem:[#allocation26_spill]] %s1701_s8  ;;  %p1336_p7 = pnand %p1678_p9, %p1270_p6 }
  0x2f   : > { %s217_s30 = sadd.s32 %s1137_s27, %s703_s4  ;;  %s212_s15 = scalar_lea.vmem [#allocation5], %s663_s13 }
  0x30   : > { %s221_s25 = sshll.u32 %s212_s15, 4  ;;  %s664_s18 = sshll.u32 %s217_s30, 6  ;;  %s1341_s25 = int_to_ptr.vmem [resolvable:$true] %s221_s25 }
  0x31   : > { %s1704_s1 = sld [smem:[#allocation28_spill]]  ;;  %s1348_s9 = scalar_lea.sflag [#allocation6], %s208_s7 }
  0x32   : > { %p865_p3 = pneg %p1336_p7 }
  0x37   : > { %s1346_s20 = scalar_lea.hbm %s1704_s1, %s664_s18  ;;  %s868_s24 = scalar_lea.hbm %s1704_s1, 768 }
  0x38   : > { %s863_s11 = scalar_lea.hbm %s1346_s20, 64  ;;  %p869_p11 = scmp.lt.u32.totalorder %s1346_s20, %s1704_s1 }
  0x39   : > { %p864_p1 = scmp.ne.s32.totalorder %s1346_s20, %s863_s11  ;;  %p870_p0 = scmp.lt.u32.totalorder %s868_s24, %s863_s11 }
  0x3a   : > { %p872_p2 = scmp.lt.u32.totalorder %s863_s11, %s1346_s20 }
  0x3b   : > { %p866_p6 = pnand %p865_p3, %p864_p1  ;;  %p871_p4 = por %p870_p0, %p869_p11 }
  0x3d   : > { %p867_p10 = pneg %p866_p6  ;;  %p873_p9 = por %p872_p2, %p871_p4 }
  0x3f   : > { %p874_p8 = pnand %p873_p9, %p867_p10 }
  0x41   : > { %877 = shalt.err (!%p874_p8)
}
  0x42   : > { %s878_s7 = scalar_lea.vmem %s1341_s25, 64  ;;  %s1143_s13 = smov [#allocation5]  }
  0x43   : > { %p879_p1 = scmp.ne.s32.totalorder %s1341_s25, %s878_s7  ;;  %s883_s30 = sshll.u32 %s1143_s13, 4  ;;  %s884_s30 = int_to_ptr.vmem [resolvable:$false] %s883_s30 }
  0x44   : > { %s885_s4 = scalar_lea.vmem %s884_s30, 128  ;;  %p886_p13 = scmp.lt.s32.totalorder %s1341_s25, %s884_s30 }
  0x45   : > { %p881_p6 = pnand %p879_p1, %p865_p3  ;;  %p887_p11 = scmp.lt.s32.totalorder %s885_s4, %s878_s7 }
  0x47   : > { %p882_p5 = pneg %p881_p6  ;;  %p888_p0 = por %p887_p11, %p886_p13 }
  0x49   : > { %p889_p2 = pnand %p888_p0, %p882_p5 }
  0x4b   : > { %892 = shalt.err (!%p889_p2)
}
  0x4c   : > { %726 = dma.hbm_to_vmem [thread:$0]  (!%p1336_p7), %s1346_s20, 64, %s1341_s25, %s1348_s9  }
  0x4d   : > { %p1705_p5 = scmp.lt.s32.totalorder %s1141_s28, 12  ;;  %p667_p13 = scmp.ge.s32.totalorder %s1141_s28, 1 }
  0x4e   : > { %p268_p9 = scmp.lt.s32.totalorder %s1141_s28, 13  ;;  %p43_p10 = scmp.eq.s32.totalorder %s1288_s12, 0 }
  0x4f   : > { %p1380_p8 = pnand %p1705_p5, %p1297_p12  ;;  %s45_s15 = sadd.s32 1, %s1121_s23 }
  0x50   : > { %p1386_p3 = pnand %p667_p13, %p268_p9  ;;  %p52_p4 = scmp.ne.s32.totalorder %s1121_s23, %s1117_s22 }
  0x51   : > { %s1395_s24 = scalar_select %p43_p10, %s1121_s23, %s45_s15  }
  0x52   : > { %s1707_s11 = scalar_select %p1386_p3, 1, 0 }
  0x53   : > { %1708 = sst [smem:[#allocation27_spill]] %s1395_s24  ;;  %p1709_p7 = scmp.eq.s32.totalorder %s1141_s28, 0 }
  0x54   : > { %p58_p6 = scmp.ne.s32.totalorder %s1117_s22, %s1113_s21  ;;  %s190_s20 = sand.u32 1, %s1121_s23  }
  0x55   : > { %p54_p1 = por %p1709_p7, %p52_p4  ;;  %s662_s25 = sshll.u32 %s1137_s27, 6 }
  0x56   : > { %p1710_p12 = scmp.eq.s32.totalorder %s1248_s29, 0  ;;  %s661_s18 = sshll.u32 %s190_s20, 2 }
  0x57   : > { %s1412_s13 = scalar_lea.hbm %s1661_s0, %s662_s25  ;;  %p1712_p0 = pmov %p1705_p5 }
  0x58   : > { %p1405_p11 = por %p1710_p12, %p58_p6  ;;  %s194_s12 = scalar_lea.vmem [#allocation2], %s661_s18 }
  0x59   : > { %p1416_p2 = pnand %p1712_p0, %p54_p1  ;;  %s201_s30 = sshll.u32 %s194_s12, 4  ;;  %s1421_s30 = int_to_ptr.vmem [resolvable:$true] %s201_s30 }
  0x5a   : > { %s1711_s14 = scalar_select %p1405_p11, 1, 0 }
  0x5b   : > { %s230_s4 = sand.u32 1, %s1097_s17   ;;  %s191_s15 = scalar_lea.sflag [#allocation3], %s190_s20 }
  0x5c   : > { %s893_s8 = scalar_lea.hbm %s1412_s13, 64  ;;  %p895_p13 = pneg %p1416_p2 }
  0x5d   : > { %p894_p5 = scmp.ne.s32.totalorder %s1412_s13, %s893_s8  ;;  %s898_s1 = scalar_lea.hbm %s1661_s0, 192 }
  0x5e   : > { %p899_p4 = scmp.lt.u32.totalorder %s1412_s13, %s1661_s0  ;;  %p900_p7 = scmp.lt.u32.totalorder %s898_s1, %s893_s8 }
  0x5f   : > { %p896_p9 = pnand %p895_p13, %p894_p5  ;;  %p902_p6 = scmp.lt.u32.totalorder %s893_s8, %s1412_s13 }
  0x60   : > { %p901_p1 = por %p900_p7, %p899_p4 }
  0x61   : > { %p897_p10 = pneg %p896_p9 }
  0x62   : > { %p903_p12 = por %p902_p6, %p901_p1 }
  0x64   : > { %p904_p0 = pnand %p903_p12, %p897_p10 }
  0x66   : > { %907 = shalt.err (!%p904_p0)
}
  0x67   : > { %s908_s20 = scalar_lea.vmem %s1421_s30, 64  ;;  %s1144_s18 = smov [#allocation2]  }
  0x68   : > { %p909_p5 = scmp.ne.s32.totalorder %s1421_s30, %s908_s20  ;;  %s913_s12 = sshll.u32 %s1144_s18, 4  ;;  %s914_s12 = int_to_ptr.vmem [resolvable:$false] %s913_s12 }
  0x69   : > { %s915_s27 = scalar_lea.vmem %s914_s12, 128  ;;  %p916_p3 = scmp.lt.s32.totalorder %s1421_s30, %s914_s12 }
  0x6a   : > { %p911_p9 = pnand %p909_p5, %p895_p13  ;;  %p917_p4 = scmp.lt.s32.totalorder %s915_s27, %s908_s20 }
  0x6c   : > { %p912_p11 = pneg %p911_p9  ;;  %p918_p7 = por %p917_p4, %p916_p3 }
  0x6e   : > { %p919_p1 = pnand %p918_p7, %p912_p11 }
  0x70   : > { %922 = shalt.err (!%p919_p1)
}
  0x71   : > { %723 = dma.hbm_to_vmem [thread:$0]  (!%p1416_p2), %s1412_s13, 64, %s1421_s30, %s191_s15  }
  0x72   : > { %s1450_s1 = smul.u32 12, %s230_s4  ;;  %p925_p11 = pneg %p1380_p8 }
  0x73   : > { %s705_s24 = smul.u32 192, %s1133_s26  ;;  %s928_s18 = scalar_lea.hbm %s1663_s2, 768 }
  0x74   : > { %s232_s21 = scalar_lea.vmem [#allocation7], %s1450_s1 }
  0x75   : > { %s1458_s7 = scalar_lea.hbm %s1663_s2, %s705_s24  ;;  %s239_s20 = sshll.u32 %s232_s21, 4  ;;  %s1461_s20 = int_to_ptr.vmem [resolvable:$true] %s239_s20 }
  0x76   : > { %s923_s13 = scalar_lea.hbm %s1458_s7, 192  ;;  %p929_p10 = scmp.lt.u32.totalorder %s1458_s7, %s1663_s2 }
  0x77   : > { %p924_p3 = scmp.ne.s32.totalorder %s1458_s7, %s923_s13  ;;  %p930_p6 = scmp.lt.u32.totalorder %s928_s18, %s923_s13 }
  0x78   : > { %p932_p0 = scmp.lt.u32.totalorder %s923_s13, %s1458_s7 }
  0x79   : > { %p926_p2 = pnand %p925_p11, %p924_p3  ;;  %p931_p12 = por %p930_p6, %p929_p10 }
  0x7b   : > { %p927_p13 = pneg %p926_p2  ;;  %p933_p5 = por %p932_p0, %p931_p12 }
  0x7d   : > { %p934_p9 = pnand %p933_p5, %p927_p13 }
  0x7f   : > { %937 = shalt.err (!%p934_p9)
}
  0x80   : > { %s938_s8 = scalar_lea.vmem %s1461_s20, 192  ;;  %s1145_s25 = smov [#allocation7]  }
  0x81   : > { %p939_p4 = scmp.ne.s32.totalorder %s1461_s20, %s938_s8  ;;  %s943_s21 = sshll.u32 %s1145_s25, 4  ;;  %s944_s21 = int_to_ptr.vmem [resolvable:$false] %s943_s21 }
  0x82   : > { %s945_s30 = scalar_lea.vmem %s944_s21, 384  ;;  %p946_p3 = scmp.lt.s32.totalorder %s1461_s20, %s944_s21 }
  0x83   : > { %p941_p7 = pnand %p939_p4, %p925_p11  ;;  %p947_p2 = scmp.lt.s32.totalorder %s945_s30, %s938_s8 }
  0x85   : > { %p942_p1 = pneg %p941_p7  ;;  %p948_p10 = por %p947_p2, %p946_p3 }
  0x87   : > { %p949_p6 = pnand %p948_p10, %p942_p1 }
  0x89   : > { %952 = shalt.err (!%p949_p6)
}
  0x8a   : > { %s1146_s13 = smov 64   ;;  %s1147_s15 = smov 4  }
  0x8b   : > { %729 = dma.hbm_to_vmem [thread:$0]  (!%p1380_p8), %s1458_s7, 192, %s1461_s20, %s1348_s9, %s1146_s13, %s1146_s13, %s1147_s15  }
  0x8c   : > { %s1497_s27 = scalar_lea.hbm %s1664_s3, %s705_s24  ;;  %s253_s8 = scalar_lea.vmem [#allocation8], %s1450_s1 }
  0x8d   : > { %s260_s25 = sshll.u32 %s253_s8, 4  ;;  %s1504_s21 = scalar_lea.sflag [#allocation9], %s230_s4  ;;  %s1500_s25 = int_to_ptr.vmem [resolvable:$true] %s260_s25 }
  0x8e   : > { %s953_s30 = scalar_lea.hbm %s1497_s27, 192  ;;  %s958_s7 = scalar_lea.hbm %s1664_s3, 768 }
  0x8f   : > { %p954_p13 = scmp.ne.s32.totalorder %s1497_s27, %s953_s30  ;;  %p959_p5 = scmp.lt.u32.totalorder %s1497_s27, %s1664_s3 }
  0x90   : > { %p960_p9 = scmp.lt.u32.totalorder %s958_s7, %s953_s30  ;;  %p962_p7 = scmp.lt.u32.totalorder %s953_s30, %s1497_s27 }
  0x91   : > { %p956_p12 = pnand %p954_p13, %p925_p11 }
  0x92   : > { %p961_p4 = por %p960_p9, %p959_p5 }
  0x93   : > { %p957_p0 = pneg %p956_p12 }
  0x94   : > { %p963_p1 = por %p962_p7, %p961_p4 }
  0x96   : > { %p964_p3 = pnand %p963_p1, %p957_p0 }
  0x98   : > { %967 = shalt.err (!%p964_p3)
}
  0x99   : > { %s968_s4 = scalar_lea.vmem %s1500_s25, 192  ;;  %s1148_s1 = smov [#allocation8]  }
  0x9a   : > { %p969_p2 = scmp.ne.s32.totalorder %s1500_s25, %s968_s4  ;;  %s973_s12 = sshll.u32 %s1148_s1, 4  ;;  %s974_s12 = int_to_ptr.vmem [resolvable:$false] %s973_s12 }
  0x9b   : > { %s975_s8 = scalar_lea.vmem %s974_s12, 384  ;;  %p976_p13 = scmp.lt.s32.totalorder %s1500_s25, %s974_s12 }
  0x9c   : > { %p971_p10 = pnand %p969_p2, %p925_p11  ;;  %p977_p12 = scmp.lt.s32.totalorder %s975_s8, %s968_s4 }
  0x9e   : > { %p972_p6 = pneg %p971_p10  ;;  %p978_p5 = por %p977_p12, %p976_p13 }
  0xa0   : > { %p979_p9 = pnand %p978_p5, %p972_p6 }
  0xa2   : > { %982 = shalt.err (!%p979_p9)
}
  0xa3   : > { %732 = dma.hbm_to_vmem [thread:$0]  (!%p1380_p8), %s1497_s27, 192, %s1500_s25, %s1504_s21, %s1146_s13, %s1146_s13, %s1147_s15  }
  0xa4   : > { %p1714_p11 = scmp.ne.s32.totalorder %s1707_s11, 0 }
  0xa5   : > { %s274_s30 = sand.u32 (!%p1714_p11), 1, %s1117_s22   ;;  %p1715_p0 = scmp.ne.s32.totalorder (!%p1714_p11), %s1711_s14, 0 }
  0xa6   : > { %272 = sbr.rel (%p1714_p11) target bundleno = 809 (0x329), region = 36  ;;  %s1536_s9 = sshll.u32 (!%p1714_p11), %s274_s30, 2 }
  0xa7   : > { %s275_s24 = scalar_lea.sflag (!%p1714_p11), [#allocation3], %s274_s30  ;;  %s278_s7 = scalar_lea.vmem (!%p1714_p11), [#allocation2], %s1536_s9 }
  0xad   : > { %1068 = dma.done.wait (%p1715_p0), %s275_s24, 64  }
  0xae   : > { %1070 = vsyncadd (%p1715_p0), %s275_s24, 4294967232  ;;  %s283_s5 = sand.u32 1, %s1248_s29   ;;  %s285_s11 = sand.u32 1, %s1105_s19  }
  0xaf   : > { %s1547_s13 = sshll.u32 %s285_s11, 2  ;;  %s284_s15 = scalar_lea.sflag [#allocation6], %s283_s5 }
  0xb0   : > { %s287_s27 = scalar_lea.vmem [#allocation5], %s1547_s13  ;;  %p1716_p8 = scmp.ne.s32.totalorder %s1693_s10, 0 }
  0xb2   : > { %1072 = dma.done.wait (%p1716_p8), %s284_s15, 64  }
  0xb3   : > { %1074 = vsyncadd (%p1716_p8), %s284_s15, 4294967232  ;;  %s294_s14 = sand.u32 1, %s1093_s16   ;;  %p1717_p4 = scmp.ne.s32.totalorder %s1697_s6, 0 }
  0xb4   : > { %s1555_s25 = smul.u32 12, %s294_s14 }
  0xb6   : > { %s296_s21 = scalar_lea.vmem [#allocation7], %s1555_s25 }
  0xb7   : > { %1076 = dma.done.wait (%p1717_p4), %s284_s15, 192  }
  0xb8   : > { %1078 = vsyncadd (%p1717_p4), %s284_s15, 4294967104  ;;  %s302_s29 = scalar_lea.sflag [#allocation9], %s294_s14  ;;  %s305_s20 = scalar_lea.vmem [#allocation8], %s1555_s25 }
  0xb9   : > { %1080 = dma.done.wait (%p1717_p4), %s302_s29, 192  }
  0xba   : > { %1082 = vsyncadd (%p1717_p4), %s302_s29, 4294967104  ;;  %v1149_v0 = vmov 0.0   ;;  %vm1150_vm0 = vmmov 0   ;;  %vm358_vm1 = vcmask 64512   ;;  %v855_v1 = vld [vmem:[%s296_s21] sm:$0xff]   ;;  %v411_v6 = vlaneseq  ;;  %v857_v17 = vld [vmem:[%s305_s20] sm:$0xff]  }
  0xbb   : > { %687 = vmatprep.subr.bf16.mxu0 %v1149_v0  ;;  %691 = vmatprep.mubr.msk.bf16.mxu0 %vm1150_vm0, %v1149_v0  ;;  %v363_v2 = vsel %vm358_vm1, %v855_v1, 0  ;;  %v856_v3 = vld [vmem:[%s296_s21 + $0x8] ss:$0 sps:$4 sm:$0xff]   ;;  %v346_v5 = vld [vmem:[%s287_s27] sm:$0xf]  ;;  %vm415_vm3 = vcmask 195584  }
  0xbc   : > { %695 = vmatprep.subr.bf16.mxu1 %v1149_v0  ;;  %699 = vmatprep.mubr.msk.bf16.mxu1 %vm1150_vm0, %v1149_v0  ;;  %v366_v4 = vsel %vm358_vm1, %v856_v3, 0  ;;  %v408_v7 = vld [vmem:[%s278_s7] sm:$0xf]  ;;  %v412_v8 = vand.u32 127, %v411_v6  ;;  %v858_v18 = vld [vmem:[%s305_s20 + $0x8] ss:$0 sps:$4 sm:$0xff]  }
  0xbd   : > { %688 = vmatpush3.bf16.xpose.msra.mxu0 %v363_v2  ;;  %v409_v9 = vunpack.c.l.bf16 %v408_v7  ;;  %vm441_vm4 = vcmask 1043456   ;;  %s1718_s6 = sld [smem:[#allocation18_spill]]  ;;  %696 = vmatpush3.bf16.msra.mxu1 %v857_v17  ;;  %s1719_s10 = sld [smem:[#allocation19_spill]]  ;;  %vm488_vm5 = vcmask 60416  }
  0xbe   : > { %689 = vmatprep.subr.bf16.mxu0 %v1149_v0  ;;  %vm413_vm2 = vcmp.lt.s32.totalorder %v412_v8, 20  ;;  %697 = vmatprep.subr.bf16.mxu1 %v1149_v0  ;;  %v443_v19 = vsel %vm441_vm4, %v858_v18, 0  ;;  %s1720_s1 = sld [smem:[#allocation25_spill]]  ;;  %s344_s8 = scalar_lea.vmem [#allocation10], %s1547_s13 }
  0xbf   : > { %s506_s30 = sshll.u32 %s344_s8, 4  ;;  %s1721_s7 = sld [smem:[#allocation29_spill]]  ;;  %s1584_s30 = int_to_ptr.vmem [resolvable:$true] %s506_s30 }
  0xc0   : > { %s491_s13 = scalar_lea.sflag [#allocation4], %s285_s11  ;;  %s983_s15 = scalar_lea.vmem %s1584_s30, 64 }
  0xc1   : > { %698 = vmatpush3.bf16.msra.mxu1 %v443_v19  ;;  %p984_p7 = scmp.ne.s32.totalorder %s1584_s30, %s983_s15  ;;  %s1151_s27 = smov [#allocation10]  }
  0xc2   : > { %s987_s14 = sshll.u32 %s1151_s27, 4  ;;  %s988_s14 = int_to_ptr.vmem [resolvable:$false] %s987_s14 }
  0xc3   : > { %s709_s18 = smul.u32 3, %s1718_s6  ;;  %s989_s25 = scalar_lea.vmem %s988_s14, 128 }
  0xc4   : > { %p1722_p1 = scmp.ne.s32.totalorder %s1720_s1, 0  ;;  %p990_p10 = scmp.lt.s32.totalorder %s1584_s30, %s988_s14 }
  0xc5   : > { %690 = vmatpush3.bf16.xpose.msra.mxu0 %v366_v4  ;;  %s502_s4 = sadd.s32 %s1719_s10, %s709_s18  ;;  %p991_p6 = scmp.lt.s32.totalorder %s989_s25, %s983_s15 }
  0xc6   : > { %s678_s12 = sshll.u32 %s502_s4, 6  ;;  %p985_p3 = pnand %p984_p7, %p1722_p1 }
  0xc7   : > { %s1582_s5 = scalar_lea.hbm %s1721_s7, %s678_s12  ;;  %p992_p13 = por %p991_p6, %p990_p10 }
  0xc8   : > { %p986_p2 = pneg %p985_p3 }
  0xca   : > { %p993_p12 = pnand %p992_p13, %p986_p2 }
  0xcc   : > { %692 = vmatmul.mubr.msk.bf16.vlgmr.msra.gmra.mrb[0].mxu0 %vm358_vm1, %v346_v5 }
 0x19f   : > { %v402_v10 = vpop.f32.mrb[0].mxu0 }
 0x1a0   : > { %v410_v11 = vmul.f32 %v409_v9, %v402_v10  ;;  %v693_v12 = vpop.f32.mrb[1].mxu0 }
 0x1a1   : > { %v405_v13 = vpop.f32.mrb[2].mxu0 }
 0x1a2   : > { %v694_v14 = vpop.f32.mrb[3].mxu0  ;;  %v414_v15 = vsel %vm413_vm2, %v410_v11, -1e+30 }
 0x1a3   : > { %v416_v16 = vsel %vm415_vm3, %v414_v15, -inf }
 0x1a4   : > { %417 = vmax.xlane.f32.xlu0 %v416_v16 }
 0x231   : > { %v418_v20 = vpop.xlane.xlu0 %417 }
 0x232   : > { %v419_v21 = vsub.f32 %v414_v15, %v418_v20 }
 0x234   : > { %v420_v22 = vmul.f32 1.442695, %v419_v21 }
 0x236   : > { %859 = vpow2.f32 %v420_v22 }
 0x240   : > { %v860_v23 = vpop.eup %859 }
 0x241   : > { %v422_v24 = vsel %vm415_vm3, %v860_v23, 0.0  ;;  %v425_v25 = vpack.c.bf16 %v860_v23, %v860_v23 }
 0x242   : > { %423 = vadd.xlane.f32.xlu0 %v422_v24 }
 0x243   : > { %700 = vmatmul.mubr.msk.bf16.vlgmr.msra.gmra.mrb[0].mxu1 %vm415_vm3, %v425_v25 }
 0x2cf   : > { %v424_v26 = vpop.xlane.xlu0 %423 }
 0x2d0   : > { %861 = vrcp.f32 %v424_v26 }
 0x2da   : > { %v862_v27 = vpop.eup %861 }
 0x316   : > { %v479_v28 = vpop.f32.mrb[0].mxu1 }
 0x317   : > { %v486_v29 = vmul.f32 %v862_v27, %v479_v28  ;;  %v701_v30 = vpop.f32.mrb[1].mxu1 }
 0x318   : > { %v482_v31 = vpop.f32.mrb[2].mxu1 }
 0x319   : > { %v487_v32 = vpack.c.bf16 %v486_v29, %v486_v29  ;;  %v702_v33 = vpop.f32.mrb[3].mxu1 }
 0x31b   : > { %489 = vst.msk [vmem:[%s344_s8] sm:$0xf] %vm488_vm5, %v487_v32 }
 0x31c   : > { %996 = shalt.err (!%p993_p12)
}
 0x31d   : > { %s997_s11 = scalar_lea.hbm %s1582_s5, 64  ;;  %s1001_s20 = scalar_lea.hbm %s1721_s7, 768 }
 0x31e   : > { %p998_p5 = scmp.ne.s32.totalorder %s1582_s5, %s997_s11  ;;  %p1002_p0 = scmp.lt.u32.totalorder %s1582_s5, %s1721_s7 }
 0x31f   : > { %p1003_p8 = scmp.lt.u32.totalorder %s1001_s20, %s997_s11  ;;  %p1005_p7 = scmp.lt.u32.totalorder %s997_s11, %s1582_s5 }
 0x320   : > { %p999_p9 = pnand %p998_p5, %p1722_p1 }
 0x321   : > { %p1004_p4 = por %p1003_p8, %p1002_p0 }
 0x322   : > { %p1000_p11 = pneg %p999_p9 }
 0x323   : > { %p1006_p3 = por %p1005_p7, %p1004_p4 }
 0x325   : > { %p1007_p2 = pnand %p1006_p3, %p1000_p11 }
 0x327   : > { %1010 = shalt.err (!%p1007_p2)
}
 0x328   : > { %718 = dma.vmem_to_hbm [thread:$0]  (%p1722_p1), %s1584_s30, 64, %s1582_s5, %s491_s13  }
 0x329 PF: > { %s1723_s18 = sld [smem:[#allocation16_spill]]  ;;  %s1724_s4 = sld [smem:[#allocation26_spill]] }
 0x32a   : > { %p738_p10 = scmp.ge.s32.totalorder %s1141_s28, 2 }
 0x32f   : > { %s518_s12 = sand.u32 1, %s1723_s18   ;;  %p1725_p6 = scmp.ne.s32.totalorder %s1724_s4, 0 }
 0x330   : > { %s519_s8 = scalar_lea.sflag [#allocation4], %s518_s12 }
 0x331   : > { %p734_p13 = pnand %p738_p10, %p1725_p6 }
 0x333   : > { %1084 = dma.done.wait (!%p734_p13), %s519_s8, 64  }
 0x334   : > { %1086 = vsyncadd (!%p734_p13), %s519_s8, 4294967232  ;;  %s26_s28 = sadd.s32 1, %s1141_s28   ;;  %s1727_s1 = sld [smem:[#allocation23_spill]] }
 0x335   : > { %p1614_p12 = scmp.ge.s32.totalorder %s26_s28, 14   ;;  %s1728_s30 = sld [smem:[#allocation17_spill]] }
 0x336   : > { %s1729_s20 = sld [smem:[#allocation24_spill]]  ;;  %s1730_s24 = sld [smem:[#allocation27_spill]] }
 0x337   : > { %s1731_s25 = sld [smem:[#allocation20_spill]]  ;;  %s1732_s5 = sld [smem:[#allocation21_spill]] }
 0x338   : > { %s1733_s27 = sld [smem:[#allocation22_spill]]  ;;  %s1734_s15 = smov %s1093_s16 }
 0x339   : > { %s1735_s16 = smov %s1097_s17  ;;  %s1737_s18 = smov %s1105_s19 }
 0x33a   : > { %s1736_s17 = smov %s1727_s1  ;;  %s1739_s21 = smov %s1117_s22 }
 0x33b   : > { %s1738_s19 = smov %s1728_s30  ;;  %s1740_s22 = smov %s1121_s23 }
 0x33c   : > { %s1741_s23 = smov %s1730_s24  ;;  %s1742_s24 = smov %s1133_s26 }
 0x33d   : > { %s1743_s26 = smov %s1732_s5  ;;  %25 = sbr.rel (!%p1614_p12) target bundleno = 17 (0x11), region = 118 }
 0x344   :  { %524 = vsyncpa [#allocation3], 1 }
 0x345   :  { %526 = vsyncpa [#allocation3 + $0x1], 1 }
 0x346   :  { %527 = vsyncpa [#allocation6], 1 }
 0x347   :  { %529 = vsyncpa [#allocation6 + $0x1], 1 }
 0x348   :  { %530 = vsyncpa [#allocation9], 1 }
 0x349   :  { %532 = vsyncpa [#allocation9 + $0x1], 1 }
 0x34a   :  { %533 = vsyncpa [#allocation4], 1 }
 0x34b   :  { %535 = vsyncpa [#allocation4 + $0x1], 1 }

</bundles_post_ra>
